<compile_context>
chip_gen: v5e
topology: v5e:2x2
jax: 0.10.0
libtpu: 0.0.40
codegen_flags: <defaults>
</compile_context>

<pallas_src>
import functools

import jax
import jax.numpy as jnp
from jax.experimental import pallas as pl
from jax.experimental.pallas import tpu as pltpu


def _round_up(x, m):
    return ((x + m - 1) // m) * m


def _row_tiling(n, tile_n):
    """(row-tile size, padded row count) for a batch of n rows."""
    if n <= tile_n:
        n_pad = _round_up(max(n, 1), 8)          # sublane granularity
        return n_pad, n_pad
    return tile_n, _round_up(n, tile_n)


# ----------------------------------------------------------------------------
# Fused encoder + reparameterization + decoder kernel.
# grid = (row tiles, channels, decoder column tiles); the column axis is the
# innermost "arbitrary" axis, so z stays resident in VMEM scratch across it and
# the encode matmul runs only once per (row tile, channel).
# ----------------------------------------------------------------------------
def _mcvae_kernel(x_ref, w_enc_ref, b_enc_ref, eps_ref, w_dec_ref, b_dec_ref,
                  mu_ref, sigma_ref, loc_ref, z_scr, *, d_pad):
    @pl.when(pl.program_id(2) == 0)
    def _encode():
        # One MXU matmul for both heads: cols [0:D_pad) = mu, [D_pad:2*D_pad) = logvar.
        h = (jnp.dot(x_ref[0], w_enc_ref[0], preferred_element_type=jnp.float32)
             + b_enc_ref[0])                                   # (TN, 2*D_pad), f32
        mu = h[:, :d_pad]
        sigma = jnp.exp(0.5 * h[:, d_pad:])                    # EUP, f32
        mu_ref[0] = mu
        sigma_ref[0] = sigma
        z_scr[...] = mu + sigma * eps_ref[0]                   # rsample, stays in VMEM

    # Decode the resident z against this column tile of the concatenated decoders.
    loc_ref[0] = (jnp.dot(z_scr[...].astype(jnp.bfloat16), w_dec_ref[...],
                          preferred_element_type=jnp.float32) + b_dec_ref[...])


def mcvae_fused(x_pad, eps, w_enc, b_enc, w_dec, b_dec, *, tile_n=512, tile_sf=2048):
    """x_pad (C, N_pad, F_pad) bf16, eps (C, N_pad, D_pad) f32,
    w_enc (C, F_pad, 2*D_pad) bf16, b_enc (C, 1, 2*D_pad) f32,
    w_dec (D_pad, SF_pad) bf16, b_dec (1, SF_pad) f32
    -> mu, sigma (C, N_pad, D_pad) f32 and loc (C, N_pad, SF_pad) f32."""
    c, n_pad, f_pad = x_pad.shape
    d_pad = eps.shape[-1]
    sf_pad = w_dec.shape[1]
    tn = min(tile_n, n_pad)
    tsf = min(tile_sf, sf_pad)
    assert n_pad % tn == 0 and sf_pad % tsf == 0

    # Scoped-VMEM budget: double-buffered tiles + z scratch, with ~50% headroom.
    per_buf = (tn * f_pad * 2 + f_pad * 2 * d_pad * 2 + 2 * d_pad * 4   # x, w_enc, b_enc
               + tn * d_pad * 4 + d_pad * tsf * 2 + tsf * 4             # eps, w_dec, b_dec
               + 2 * tn * d_pad * 4 + tn * tsf * 4)                     # mu, sigma, loc
    vmem_limit = min(max(3 * per_buf + tn * d_pad * 4, 16 << 20), 64 << 20)

    grid = (n_pad // tn, c, sf_pad // tsf)
    out_sds = (jax.ShapeDtypeStruct((c, n_pad, d_pad), jnp.float32),
               jax.ShapeDtypeStruct((c, n_pad, d_pad), jnp.float32),
               jax.ShapeDtypeStruct((c, n_pad, sf_pad), jnp.float32))
    return pl.pallas_call(
        functools.partial(_mcvae_kernel, d_pad=d_pad),
        out_shape=out_sds,
        grid=grid,
        in_specs=[
            pl.BlockSpec((1, tn, f_pad), lambda ni, ci, sj: (ci, ni, 0)),        # x (bf16)
            pl.BlockSpec((1, f_pad, 2 * d_pad), lambda ni, ci, sj: (ci, 0, 0)),  # enc W (bf16)
            pl.BlockSpec((1, 1, 2 * d_pad), lambda ni, ci, sj: (ci, 0, 0)),      # enc b (f32)
            pl.BlockSpec((1, tn, d_pad), lambda ni, ci, sj: (ci, ni, 0)),        # eps (f32)
            pl.BlockSpec((d_pad, tsf), lambda ni, ci, sj: (0, sj)),              # dec W (bf16)
            pl.BlockSpec((1, tsf), lambda ni, ci, sj: (0, sj)),                  # dec b (f32)
        ],
        out_specs=(
            pl.BlockSpec((1, tn, d_pad), lambda ni, ci, sj: (ci, ni, 0)),        # mu
            pl.BlockSpec((1, tn, d_pad), lambda ni, ci, sj: (ci, ni, 0)),        # sigma
            pl.BlockSpec((1, tn, tsf), lambda ni, ci, sj: (ci, ni, sj)),         # loc
        ),
        scratch_shapes=[pltpu.VMEM((tn, d_pad), jnp.float32)],                   # resident z
        compiler_params=pltpu.CompilerParams(
            dimension_semantics=("parallel", "parallel", "arbitrary"),
            vmem_limit_bytes=vmem_limit),
    )(x_pad, w_enc, b_enc, eps, w_dec, b_dec)


# ----------------------------------------------------------------------------
# Parameters: per-channel init (matches the torch module) + one-time packing
# ----------------------------------------------------------------------------
def init_mcvae_params(key, latent_dim, n_feats, noise_init_logvar=-3.0):
    params = []
    for fc in n_feats:
        key, k1, k2, k3 = jax.random.split(key, 4)
        params.append(dict(
            w_mu=0.1 * jax.random.normal(k1, (fc, latent_dim), jnp.float32),
            b_mu=jnp.zeros((1, latent_dim), jnp.float32),
            w_logvar=0.1 * jax.random.normal(k2, (fc, latent_dim), jnp.float32),
            b_logvar=jnp.zeros((1, latent_dim), jnp.float32),
            w_dec=0.1 * jax.random.normal(k3, (latent_dim, fc), jnp.float32),
            b_dec=jnp.zeros((1, fc), jnp.float32),
            noise_logvar=jnp.full((1, fc), noise_init_logvar, jnp.float32),
        ))
    return params


def pack_mcvae_params(params, latent_dim):
    """One-time packing into padded/stacked layouts.  Weights stored bf16 (MXU
    operands), biases f32 (added after f32 accumulation)."""
    n_feats = [int(p["w_mu"].shape[0]) for p in params]
    f_pad = _round_up(max(n_feats), 128)
    d_pad = _round_up(latent_dim, 128)

    w_enc, b_enc = [], []
    for p, fc in zip(params, n_feats):
        w = jnp.zeros((f_pad, 2 * d_pad), jnp.float32)
        w = w.at[:fc, :latent_dim].set(p["w_mu"])
        w = w.at[:fc, d_pad:d_pad + latent_dim].set(p["w_logvar"])
        b = jnp.zeros((1, 2 * d_pad), jnp.float32)
        b = b.at[:, :latent_dim].set(p["b_mu"])
        b = b.at[:, d_pad:d_pad + latent_dim].set(p["b_logvar"])
        w_enc.append(w)
        b_enc.append(b)
    w_enc = jnp.stack(w_enc).astype(jnp.bfloat16)       # (C, F_pad, 2*D_pad)
    b_enc = jnp.stack(b_enc)                            # (C, 1, 2*D_pad) f32

    sum_f = sum(n_feats)
    sf_pad = _round_up(sum_f, 128)
    f_off, off = [], 0
    for fc in n_feats:
        f_off.append(off)
        off += fc
    w_dec = jnp.zeros((d_pad, sf_pad), jnp.float32)
    b_dec = jnp.zeros((1, sf_pad), jnp.float32)
    for p, fc, o in zip(params, n_feats, f_off):
        w_dec = w_dec.at[:latent_dim, o:o + fc].set(p["w_dec"])
        b_dec = b_dec.at[:, o:o + fc].set(p["b_dec"])
    w_dec = w_dec.astype(jnp.bfloat16)                  # (D_pad, SF_pad)

    # hoisted once: decoder output scale = exp(0.5 * noise_logvar) per channel
    noise_scale = [jnp.exp(0.5 * p["noise_logvar"]) for p in params]

    return dict(latent_dim=latent_dim, d_pad=d_pad, f_pad=f_pad,
                n_feats=n_feats, f_off=f_off,
                w_enc=w_enc, b_enc=b_enc, w_dec=w_dec, b_dec=b_dec,
                noise_scale=noise_scale)


def pack_inputs(packed, x, *, tile_n=512):
    """Stack + zero-pad the per-channel inputs into one (C, N_pad, F_pad) bf16 slab.
    Do this ONCE outside the hot path (it is an extra HBM round trip of x)."""
    # TODO(synk): for strongly heterogeneous channel widths, lane-concatenate the
    # channels into one (N, sum_F_pad) slab + scalar-prefetched column offsets
    # instead of padding every channel to max(F).
    n = x[0].shape[0]
    f_pad = packed["f_pad"]
    _, n_pad = _row_tiling(n, tile_n)
    return jnp.stack(
        [jnp.pad(xc, ((0, n_pad - n), (0, f_pad - xc.shape[1]))) for xc in x]
    ).astype(jnp.bfloat16)


# ----------------------------------------------------------------------------
# MCVAE forward (glue in plain JAX, all math in the single fused Pallas kernel)
# ----------------------------------------------------------------------------
def mcvae_forward(packed, x, eps, x_pad=None, *, tile_n=512, tile_sf=2048):
    """x: list of (N, F_c) f32.  eps: (C, N_pad, D_pad) standard normals with the
    padded rows/columns zeroed.  x_pad: optional pre-packed input (pack_inputs)
    so the stack/pad stays out of the hot path.  Returns (p, aux) matching
    MCVAE.forward with sparse=False, nodecoding=False."""
    if x_pad is None:
        x_pad = pack_inputs(packed, x, tile_n=tile_n)
    c = len(x)
    n = x[0].shape[0]
    d = packed["latent_dim"]

    mu, sigma, loc = mcvae_fused(x_pad, eps, packed["w_enc"], packed["b_enc"],
                                 packed["w_dec"], packed["b_dec"],
                                 tile_n=tile_n, tile_sf=tile_sf)

    qs = [{"loc": mu[ci, :n, :d], "scale": sigma[ci, :n, :d]} for ci in range(c)]
    p = []
    for c1 in range(c):
        o, fc1 = packed["f_off"][c1], packed["n_feats"][c1]
        scale1 = packed["noise_scale"][c1]
        # p[c1][c2] = Normal(z_{c2} @ W_dec_{c1} + b_dec_{c1}, exp(0.5*noise_logvar_{c1}))
        p.append([{"loc": loc[c2, :n, o:o + fc1], "scale": scale1} for c2 in range(c)])
    return p, {"q": qs, "x": x}
    # TODO(synk): sparse=True branch (logvar = log_alpha + 2*log|mu|) and the
    # nodecoding=True early return are not exercised here (defaults are False).


if __name__ == "__main__":
    # Small shapes consistent with the module: N=4, C=2 channels, F=[16, 24], D=8.
    latent_dim = 8
    n_feats = [16, 24]
    batch = 4
    n_channels = len(n_feats)

    key = jax.random.PRNGKey(0)
    key, pkey, xkey, ekey = jax.random.split(key, 4)
    params = init_mcvae_params(pkey, latent_dim, n_feats)
    packed = pack_mcvae_params(params, latent_dim)

    x = []
    for fc in n_feats:
        xkey, sub = jax.random.split(xkey)
        x.append(jax.random.normal(sub, (batch, fc), jnp.float32))
    x_pad = pack_inputs(packed, x)                         # hoisted out of hot path

    # single batched RNG draw; padded rows/lanes zeroed so padded z lanes are 0
    _, n_pad = _row_tiling(batch, 512)
    eps_core = jax.random.normal(ekey, (n_channels, batch, latent_dim), jnp.float32)
    eps = jnp.zeros((n_channels, n_pad, packed["d_pad"]), jnp.float32)
    eps = eps.at[:, :batch, :latent_dim].set(eps_core)

    p, aux = mcvae_forward(packed, x, eps, x_pad=x_pad)
    jax.block_until_ready(jax.tree_util.tree_leaves((p, aux["q"])))

    # shape checks
    assert len(p) == n_channels and all(len(pi) == n_channels for pi in p)
    for c1, fc in enumerate(n_feats):
        for c2 in range(n_channels):
            assert p[c1][c2]["loc"].shape == (batch, fc)
            assert p[c1][c2]["scale"].shape == (1, fc)
    for ci in range(n_channels):
        assert aux["q"][ci]["loc"].shape == (batch, latent_dim)
        assert aux["q"][ci]["scale"].shape == (batch, latent_dim)

    # numerical sanity vs a plain-JAX reference computed with the same bf16
    # operand rounding the kernel uses (MXU operands are bf16, accumulation f32).
    def _bf(a):
        return a.astype(jnp.bfloat16).astype(jnp.float32)

    def _close(a, b, tol=2e-2):
        return bool(jnp.allclose(a, b, rtol=tol, atol=tol))

    ok = True
    z_ref = []
    for ci, (xc, pc) in enumerate(zip(x, params)):
        mu_r = _bf(xc) @ _bf(pc["w_mu"]) + pc["b_mu"]
        lv_r = _bf(xc) @ _bf(pc["w_logvar"]) + pc["b_logvar"]
        sg_r = jnp.exp(0.5 * lv_r)
        z_ref.append(mu_r + sg_r * eps_core[ci])
        ok &= _close(aux["q"][ci]["loc"], mu_r)
        ok &= _close(aux["q"][ci]["scale"], sg_r)
    for c1, pc in enumerate(params):
        for c2 in range(n_channels):
            loc_r = _bf(z_ref[c2]) @ _bf(pc["w_dec"]) + pc["b_dec"]
            ok &= _close(p[c1][c2]["loc"], loc_r)
            ok &= _close(p[c1][c2]["scale"], jnp.exp(0.5 * pc["noise_logvar"]), 1e-5)
    assert ok, "numerical mismatch vs plain-JAX reference"

    print("KERNEL_OK")
</pallas_src>

<mosaic_0001>
module attributes {stable_mosaic.version = 11 : i64} {
  func.func @_mcvae_kernel(%arg0: i32, %arg1: i32, %arg2: i32, %arg3: memref<1x8x128xbf16, #tpu.memory_space<vmem>>, %arg4: memref<1x128x256xbf16, #tpu.memory_space<vmem>>, %arg5: memref<1x1x256xf32, #tpu.memory_space<vmem>>, %arg6: memref<1x8x128xf32, #tpu.memory_space<vmem>>, %arg7: memref<128x128xbf16, #tpu.memory_space<vmem>>, %arg8: memref<1x128xf32, #tpu.memory_space<vmem>>, %arg9: memref<1x8x128xf32, #tpu.memory_space<vmem>>, %arg10: memref<1x8x128xf32, #tpu.memory_space<vmem>>, %arg11: memref<1x8x128xf32, #tpu.memory_space<vmem>>, %arg12: memref<8x128xf32, #tpu.memory_space<vmem>>) attributes {dimension_semantics = [#tpu.dimension_semantics<parallel>, #tpu.dimension_semantics<parallel>, #tpu.dimension_semantics<arbitrary>], iteration_bounds = array<i64: 1, 2, 1>, scalar_prefetch = 0 : i64, scratch_operands = 1 : i64, tpu.core_type = #tpu.core_type<tc>, window_params = [{transform_indices = @transform_0, window_bounds = array<i64: 1, 8, 128>}, {transform_indices = @transform_1, window_bounds = array<i64: 1, 128, 256>}, {transform_indices = @transform_2, window_bounds = array<i64: 1, 1, 256>}, {transform_indices = @transform_3, window_bounds = array<i64: 1, 8, 128>}, {transform_indices = @transform_4, window_bounds = array<i64: 128, 128>}, {transform_indices = @transform_5, window_bounds = array<i64: 1, 128>}, {transform_indices = @transform_6, window_bounds = array<i64: 1, 8, 128>}, {transform_indices = @transform_7, window_bounds = array<i64: 1, 8, 128>}, {transform_indices = @transform_8, window_bounds = array<i64: 1, 8, 128>}]} {
    %c0_i32 = arith.constant 0 : i32
    %0 = arith.cmpi eq, %arg2, %c0_i32 : i32
    %1 = arith.extui %0 : i1 to i32
    %c0_i32_0 = arith.constant 0 : i32
    %2 = arith.cmpi ne, %1, %c0_i32_0 : i32
    scf.if %2 {
      %c0_9 = arith.constant 0 : index
      %c0_10 = arith.constant 0 : index
      %c0_11 = arith.constant 0 : index
      %13 = vector.load %arg3[%c0_9, %c0_10, %c0_11] : memref<1x8x128xbf16, #tpu.memory_space<vmem>>, vector<1x8x128xbf16>
      %14 = vector.shape_cast %13 : vector<1x8x128xbf16> to vector<8x128xbf16>
      %c0_12 = arith.constant 0 : index
      %c0_13 = arith.constant 0 : index
      %c0_14 = arith.constant 0 : index
      %15 = vector.load %arg4[%c0_12, %c0_13, %c0_14] : memref<1x128x256xbf16, #tpu.memory_space<vmem>>, vector<1x128x256xbf16>
      %16 = vector.shape_cast %15 : vector<1x128x256xbf16> to vector<128x256xbf16>
      %cst_15 = arith.constant dense<0.000000e+00> : vector<8x256xf32>
      %17 = tpu.matmul %14, %16, %cst_15 {dimension_numbers = #tpu.dot_dimension_numbers<[1], [0], [0], [1], [0, 0, 1, 1], [], []>} : vector<8x128xbf16>, vector<128x256xbf16>, vector<8x256xf32> -> vector<8x256xf32>
      %c0_16 = arith.constant 0 : index
      %c0_17 = arith.constant 0 : index
      %c0_18 = arith.constant 0 : index
      %18 = vector.load %arg5[%c0_16, %c0_17, %c0_18] : memref<1x1x256xf32, #tpu.memory_space<vmem>>, vector<1x1x256xf32>
      %19 = vector.shape_cast %18 : vector<1x1x256xf32> to vector<1x256xf32>
      %20 = vector.broadcast %19 : vector<1x256xf32> to vector<8x256xf32>
      %21 = arith.addf %17, %20 : vector<8x256xf32>
      %22 = vector.extract_strided_slice %21 {offsets = [0, 0], sizes = [8, 128], strides = [1, 1]} : vector<8x256xf32> to vector<8x128xf32>
      %23 = vector.extract_strided_slice %21 {offsets = [0, 128], sizes = [8, 128], strides = [1, 1]} : vector<8x256xf32> to vector<8x128xf32>
      %cst_19 = arith.constant 5.000000e-01 : f32
      %24 = vector.broadcast %cst_19 : f32 to vector<8x128xf32>
      %25 = arith.mulf %24, %23 : vector<8x128xf32>
      %26 = math.exp %25 : vector<8x128xf32>
      %c0_20 = arith.constant 0 : index
      %c0_21 = arith.constant 0 : index
      %c0_22 = arith.constant 0 : index
      %27 = vector.load %arg9[%c0_20, %c0_21, %c0_22] : memref<1x8x128xf32, #tpu.memory_space<vmem>>, vector<1x8x128xf32>
      %28 = vector.shape_cast %27 : vector<1x8x128xf32> to vector<8x128xf32>
      %29 = vector.shape_cast %22 : vector<8x128xf32> to vector<1x8x128xf32>
      tpu.vector_store %arg9[%c0_20, %c0_21, %c0_22], %29 {strides = array<i32>} : memref<1x8x128xf32, #tpu.memory_space<vmem>>, vector<1x8x128xf32>,
      %c0_23 = arith.constant 0 : index
      %c0_24 = arith.constant 0 : index
      %c0_25 = arith.constant 0 : index
      %30 = vector.load %arg10[%c0_23, %c0_24, %c0_25] : memref<1x8x128xf32, #tpu.memory_space<vmem>>, vector<1x8x128xf32>
      %31 = vector.shape_cast %30 : vector<1x8x128xf32> to vector<8x128xf32>
      %32 = vector.shape_cast %26 : vector<8x128xf32> to vector<1x8x128xf32>
      tpu.vector_store %arg10[%c0_23, %c0_24, %c0_25], %32 {strides = array<i32>} : memref<1x8x128xf32, #tpu.memory_space<vmem>>, vector<1x8x128xf32>,
      %c0_26 = arith.constant 0 : index
      %c0_27 = arith.constant 0 : index
      %c0_28 = arith.constant 0 : index
      %33 = vector.load %arg6[%c0_26, %c0_27, %c0_28] : memref<1x8x128xf32, #tpu.memory_space<vmem>>, vector<1x8x128xf32>
      %34 = vector.shape_cast %33 : vector<1x8x128xf32> to vector<8x128xf32>
      %35 = arith.mulf %26, %34 : vector<8x128xf32>
      %36 = arith.addf %22, %35 : vector<8x128xf32>
      %c0_29 = arith.constant 0 : index
      %c0_30 = arith.constant 0 : index
      %37 = vector.load %arg12[%c0_29, %c0_30] : memref<8x128xf32, #tpu.memory_space<vmem>>, vector<8x128xf32>
      tpu.vector_store %arg12[%c0_29, %c0_30], %36 {strides = array<i32>} : memref<8x128xf32, #tpu.memory_space<vmem>>, vector<8x128xf32>,
    } else {
    }
    %c0 = arith.constant 0 : index
    %c0_1 = arith.constant 0 : index
    %3 = vector.load %arg12[%c0, %c0_1] : memref<8x128xf32, #tpu.memory_space<vmem>>, vector<8x128xf32>
    %4 = arith.truncf %3 : vector<8x128xf32> to vector<8x128xbf16>
    %c0_2 = arith.constant 0 : index
    %c0_3 = arith.constant 0 : index
    %5 = vector.load %arg7[%c0_2, %c0_3] : memref<128x128xbf16, #tpu.memory_space<vmem>>, vector<128x128xbf16>
    %cst = arith.constant dense<0.000000e+00> : vector<8x128xf32>
    %6 = tpu.matmul %4, %5, %cst {dimension_numbers = #tpu.dot_dimension_numbers<[1], [0], [0], [1], [0, 0, 1, 1], [], []>} : vector<8x128xbf16>, vector<128x128xbf16>, vector<8x128xf32> -> vector<8x128xf32>
    %c0_4 = arith.constant 0 : index
    %c0_5 = arith.constant 0 : index
    %7 = vector.load %arg8[%c0_4, %c0_5] : memref<1x128xf32, #tpu.memory_space<vmem>>, vector<1x128xf32>
    %8 = vector.broadcast %7 : vector<1x128xf32> to vector<8x128xf32>
    %9 = arith.addf %6, %8 : vector<8x128xf32>
    %c0_6 = arith.constant 0 : index
    %c0_7 = arith.constant 0 : index
    %c0_8 = arith.constant 0 : index
    %10 = vector.load %arg11[%c0_6, %c0_7, %c0_8] : memref<1x8x128xf32, #tpu.memory_space<vmem>>, vector<1x8x128xf32>
    %11 = vector.shape_cast %10 : vector<1x8x128xf32> to vector<8x128xf32>
    %12 = vector.shape_cast %9 : vector<8x128xf32> to vector<1x8x128xf32>
    tpu.vector_store %arg11[%c0_6, %c0_7, %c0_8], %12 {strides = array<i32>} : memref<1x8x128xf32, #tpu.memory_space<vmem>>, vector<1x8x128xf32>,
    return
  }
  func.func @transform_0(%arg0: i32, %arg1: i32, %arg2: i32) -> (i32, i32, i32) {
    %c0_i32 = arith.constant 0 : i32
    %c0_i32_0 = arith.constant 0 : i32
    return %arg1, %arg0, %c0_i32 : i32, i32, i32
  }
  func.func @transform_1(%arg0: i32, %arg1: i32, %arg2: i32) -> (i32, i32, i32) {
    %c0_i32 = arith.constant 0 : i32
    %c0_i32_0 = arith.constant 0 : i32
    %c0_i32_1 = arith.constant 0 : i32
    return %arg1, %c0_i32, %c0_i32_0 : i32, i32, i32
  }
  func.func @transform_2(%arg0: i32, %arg1: i32, %arg2: i32) -> (i32, i32, i32) {
    %c0_i32 = arith.constant 0 : i32
    %c0_i32_0 = arith.constant 0 : i32
    %c0_i32_1 = arith.constant 0 : i32
    return %arg1, %c0_i32, %c0_i32_0 : i32, i32, i32
  }
  func.func @transform_3(%arg0: i32, %arg1: i32, %arg2: i32) -> (i32, i32, i32) {
    %c0_i32 = arith.constant 0 : i32
    %c0_i32_0 = arith.constant 0 : i32
    return %arg1, %arg0, %c0_i32 : i32, i32, i32
  }
  func.func @transform_4(%arg0: i32, %arg1: i32, %arg2: i32) -> (i32, i32) {
    %c0_i32 = arith.constant 0 : i32
    %c0_i32_0 = arith.constant 0 : i32
    return %c0_i32, %arg2 : i32, i32
  }
  func.func @transform_5(%arg0: i32, %arg1: i32, %arg2: i32) -> (i32, i32) {
    %c0_i32 = arith.constant 0 : i32
    %c0_i32_0 = arith.constant 0 : i32
    return %c0_i32, %arg2 : i32, i32
  }
  func.func @transform_6(%arg0: i32, %arg1: i32, %arg2: i32) -> (i32, i32, i32) {
    %c0_i32 = arith.constant 0 : i32
    %c0_i32_0 = arith.constant 0 : i32
    return %arg1, %arg0, %c0_i32 : i32, i32, i32
  }
  func.func @transform_7(%arg0: i32, %arg1: i32, %arg2: i32) -> (i32, i32, i32) {
    %c0_i32 = arith.constant 0 : i32
    %c0_i32_0 = arith.constant 0 : i32
    return %arg1, %arg0, %c0_i32 : i32, i32, i32
  }
  func.func @transform_8(%arg0: i32, %arg1: i32, %arg2: i32) -> (i32, i32, i32) {
    %c0_i32 = arith.constant 0 : i32
    return %arg1, %arg0, %arg2 : i32, i32, i32
  }
}

</mosaic_0001>

<bundles_post_ra>
// kernel: tpu_custom_call.1
= control target key start
LH: loop header
LB: loop body
LE: loop exit
PB: predicated region body
PF: predicated region fallthrough
CT: control target
= control target key end

     0   :  { %s1951_s0 = inlined_call_operand.hbm [shape: bf16[2,8,128], index: 0, kind: input, shape index: {}]   ;;  %s1952_s1 = inlined_call_operand.hbm [shape: bf16[2,128,256], index: 1, kind: input, shape index: {}]   ;;  %s1953_s2 = inlined_call_operand.hbm [shape: f32[2,1,256], index: 2, kind: input, shape index: {}]   ;;  %s1954_s3 = inlined_call_operand.hbm [shape: f32[2,8,128], index: 3, kind: input, shape index: {}]   ;;  %s1955_s4 = inlined_call_operand.hbm [shape: bf16[128,128], index: 4, kind: input, shape index: {}]   ;;  %s1956_s5 = inlined_call_operand.vmem [shape: f32[1,128], index: 5, kind: input, shape index: {}]   ;;  %s1957_s6 = inlined_call_operand.hbm [shape: f32[2,8,128], index: 6, kind: output, shape index: {0}]   ;;  %s1958_s7 = inlined_call_operand.hbm [shape: f32[2,8,128], index: 7, kind: output, shape index: {1}]   ;;  %s1959_s8 = inlined_call_operand.hbm [shape: f32[2,8,128], index: 8, kind: output, shape index: {2}]  }
   0x1   :  { %1967 = sst [smem:[#allocation27_spill]] %s1951_s0 }
   0x2   :  { %1968 = sst [smem:[#allocation28_spill]] %s1952_s1 }
   0x3   :  { %1969 = sst [smem:[#allocation29_spill]] %s1955_s4 }
   0x4   :  { %1970 = sst [smem:[#allocation30_spill]] %s1956_s5 }
   0x5   :  { %1971 = sst [smem:[#allocation31_spill]] %s1959_s8 }
   0x6   :  { %14 = vsyncpa [#allocation4], 0 }
   0x7   :  { %16 = vsyncpa [#allocation4 + $0x1], 0 }
   0x8   :  { %17 = vsyncpa [#allocation7], 0 }
   0x9   :  { %19 = vsyncpa [#allocation7 + $0x1], 0 }
   0xa   :  { %20 = vsyncpa [#allocation10], 0 }
   0xb   :  { %22 = vsyncpa [#allocation10 + $0x1], 0 }
   0xc   :  { %23 = vsyncpa [#allocation5], 0 }
   0xd   :  { %25 = vsyncpa [#allocation5 + $0x1], 0 }
   0xe   :  { %26 = vsyncpa [#allocation14], 0 }
   0xf   :  { %28 = vsyncpa [#allocation14 + $0x1], 0  ;;  %s1665_s27 = smov 0   ;;  %s1667_s28 = smov 0  }
  0x10   :  { %s1669_s29 = smov 0   ;;  %s1671_s30 = smov 0  }
  0x11   :  { %s1673_s9 = smov 0   ;;  %s1675_s10 = smov 0  }
  0x12 LB: > { %1972 = sst [smem:[#allocation22_spill]] %s1593_s27  ;;  %s1696_s11 = sadd.s32 4294967295, %s1613_s10   ;;  %s1613_s10 = sphi %s1675_s10, %s34_s10   ;;  %s1609_s9 = sphi %s1673_s9, %s1997_s9   ;;  %s1605_s30 = sphi %s1671_s30, %s1996_s30   ;;  %s1601_s29 = sphi %s1669_s29, %s1992_s29   ;;  %s1597_s28 = sphi %s1667_s28, %s1995_s28   ;;  %s1593_s27 = sphi %s1665_s27, %s1994_s27  }
  0x13   : > { %1973 = sst [smem:[#allocation23_spill]] %s1601_s29  ;;  %s1960_s12 = sadd.s32 4294967294, %s1613_s10  }
  0x14   : > { %p75_p0 = scmp.ne.s32.totalorder %s1597_s28, %s1593_s27  ;;  %p76_p1 = scmp.eq.s32.totalorder %s1696_s11, 0 }
  0x15   : > { %p233_p2 = scmp.eq.s32.totalorder %s1696_s11, 1  ;;  %p239_p3 = scmp.eq.s32.totalorder %s1960_s12, 1 }
  0x16   : > { %p1707_p4 = por %p76_p1, %p75_p0  ;;  %p1053_p5 = scmp.ge.s32.totalorder %s1613_s10, 1 }
  0x17   : > { %p1712_p6 = por %p239_p3, %p75_p0  ;;  %p304_p7 = scmp.lt.s32.totalorder %s1613_s10, 3 }
  0x18   : > { %s1977_s4 = sld [smem:[#allocation29_spill]]  ;;  %s1615_s19 = smov [#allocation11]  }
  0x19   : > { %s1975_s14 = scalar_select %p1712_p6, 1, 0 }
  0x1a   : > { %p1720_p8 = pnand %p1053_p5, %p304_p7  ;;  %s319_s20 = sshll.u32 %s1615_s19, 4  ;;  %s320_s20 = int_to_ptr.vmem [resolvable:$true] %s319_s20 }
  0x1b   : > { %1976 = sst [smem:[#allocation24_spill]] %s1975_s14  ;;  %p1056_p11 = scmp.ge.s32.totalorder %s1613_s10, 2 }
  0x1c   : > { %p1222_p9 = pneg %p1720_p8  ;;  %s1616_s21 = smov 64  }
  0x1d   : > { %s1617_s22 = smov 4   ;;  %s49_s23 = sadd.s32 1, %s1609_s9 }
  0x1e   : > { %s317_s17 = sshll.u32 %s1977_s4, 4  ;;  %p1223_p10 = pnand %p1222_p9, %p76_p1  ;;  %s318_s17 = int_to_ptr.hbm [resolvable:$true] %s317_s17 }
  0x1f   : > { %p51_p12 = scmp.ge.s32.totalorder %s49_s23, 2  ;;  %s62_s24 = sadd.s32 1, %s1601_s29 }
  0x20   : > { %1225 = dma.hbm_to_vmem [thread:$0]  (!%p1223_p10), %s318_s17, 1024, %s320_s20, [#allocation10], %s1616_s21, %s1616_s21, %s1617_s22  }
  0x21   : > { %p69_p13 = scmp.ne.s32.totalorder %s1601_s29, %s1597_s28  ;;  %p70_p0 = scmp.eq.s32.totalorder %s1613_s10, 0 }
  0x22   : > { %s1999_s23 = smov (%p51_p12, %s49_s23), 0  ;;  %p1250_p7 = scmp.lt.s32.totalorder %s1613_s10, 2 }
  0x23   : > { %1979 = sst [smem:[#allocation25_spill]] %s1999_s23  ;;  %p71_p3 = por %p70_p0, %p69_p13 }
  0x24   : > { %p1738_p5 = por %p233_p2, %p69_p13  ;;  %s57_s26 = ssub.s32 %s1609_s9, %s1999_s23 }
  0x25   : > { %p60_p9 = scmp.eq.s32.totalorder %s57_s26, 0  ;;  %s1746_s15 = sand.u32 1, %s1601_s29  }
  0x26   : > { %p1748_p10 = pnand %p1250_p7, %p71_p3  ;;  %s1966_s17 = sand.u32 1, %s1613_s10  }
  0x27   : > { %s1754_s19 = scalar_select %p60_p9, %s1601_s29, %s62_s24  }
  0x28   : > { %s1059_s20 = sshll.u32 %s1746_s15, 7  ;;  %s1179_s21 = sshll.u32 %s1609_s9, 7 }
  0x29   : > { %1982 = sst [smem:[#allocation26_spill]] %s1754_s19  ;;  %s363_s23 = scalar_lea.vmem [#allocation6], %s1059_s20 }
  0x2a   : > { %s1983_s1 = sld [smem:[#allocation28_spill]]  ;;  %s371_s14 = sshll.u32 %s363_s23, 4  ;;  %s372_s14 = int_to_ptr.vmem [resolvable:$true] %s371_s14 }
  0x2b   : > { %s360_s27 = scalar_lea.sflag [#allocation7], %s1966_s17  ;;  %s1618_s5 = smov 128  }
  0x2c   : > { %s1619_s24 = smov 8   ;;  %s1057_s19 = sshll.u32 %s1746_s15, 2 }
  0x2d   : > { %s1058_s29 = sshll.u32 %s1609_s9, 2  ;;  %s1984_s0 = sld [smem:[#allocation27_spill]] }
  0x2e   : > { %s343_s20 = scalar_lea.vmem [#allocation3], %s1057_s19  ;;  %s1062_s22 = sshll.u32 %s1746_s15, 1 }
  0x2f   : > { %s352_s23 = sshll.u32 %s343_s20, 4  ;;  %s340_s17 = scalar_lea.sflag [#allocation4], %s1746_s15  ;;  %s353_s23 = int_to_ptr.vmem [resolvable:$true] %s352_s23 }
  0x30   : > { %s368_s4 = scalar_lea.hbm %s1983_s1, %s1179_s21  ;;  %s1063_s1 = sshll.u32 %s1609_s9, 1 }
  0x31   : > { %s369_s26 = sshll.u32 %s368_s4, 4  ;;  %s385_s8 = scalar_lea.vmem [#allocation8], %s1062_s22  ;;  %s370_s26 = int_to_ptr.hbm [resolvable:$true] %s369_s26 }
  0x32   : > { %1232 = dma.hbm_to_vmem [thread:$0]  (!%p1748_p10), %s370_s26, 2048, %s372_s14, %s360_s27, %s1618_s5, %s1618_s5, %s1619_s24  }
  0x33   : > { %s348_s4 = scalar_lea.hbm %s1984_s0, %s1058_s29  ;;  %s389_s26 = scalar_lea.hbm %s1953_s2, %s1063_s1 }
  0x34   : > { %s350_s21 = sshll.u32 %s348_s4, 4  ;;  %s393_s29 = sshll.u32 %s385_s8, 4  ;;  %s351_s21 = int_to_ptr.hbm [resolvable:$true] %s350_s21  ;;  %s394_s29 = int_to_ptr.vmem [resolvable:$true] %s393_s29 }
  0x35   : > { %1229 = dma.hbm_to_vmem [thread:$0]  (!%p1748_p10), %s351_s21, 64, %s353_s23, %s340_s17  }
  0x36   : > { %s391_s19 = sshll.u32 %s389_s26, 4  ;;  %s1064_s24 = sshll.u32 %s1746_s15, 3  ;;  %s392_s19 = int_to_ptr.hbm [resolvable:$true] %s391_s19 }
  0x37   : > { %1235 = dma.hbm_to_vmem [thread:$0]  (!%p1748_p10), %s392_s19, 32, %s394_s29, %s360_s27  }
  0x38   : > { %s1065_s12 = sshll.u32 %s1609_s9, 3  ;;  %s404_s21 = scalar_lea.vmem [#allocation9], %s1064_s24 }
  0x39   : > { %s409_s17 = scalar_lea.hbm %s1954_s3, %s1065_s12  ;;  %s413_s0 = sshll.u32 %s404_s21, 4  ;;  %s414_s0 = int_to_ptr.vmem [resolvable:$true] %s413_s0 }
  0x3a   : > { %s411_s23 = sshll.u32 %s409_s17, 4  ;;  %s1985_s1 = sand.u32 1, %s1613_s10   ;;  %s412_s23 = int_to_ptr.hbm [resolvable:$true] %s411_s23 }
  0x3b   : > { %s401_s5 = scalar_lea.sflag [#allocation10], %s1985_s1  ;;  %422 = sbr.rel (%p1720_p8) target bundleno = 393 (0x189), region = 44 }
  0x3c   : > { %1238 = dma.hbm_to_vmem [thread:$0]  (!%p1748_p10), %s412_s23, 128, %s414_s0, %s401_s5  }
  0x3d   : > { %s1792_s27 = sand.u32 (!%p1720_p8), 1, %s1597_s28  }
  0x3e   : > { %s1067_s15 = sshll.u32 (!%p1720_p8), %s1792_s27, 2  ;;  %s425_s22 = scalar_lea.sflag (!%p1720_p8), [#allocation4], %s1792_s27 }
  0x3f   : > { %s1796_s14 = scalar_lea.vmem (!%p1720_p8), [#allocation3], %s1067_s15 }
  0x40   : > { %1568 = dma.done.wait (%p1707_p4), %s425_s22, 64  }
  0x41   : > { %1570 = vsyncadd (%p1707_p4), %s425_s22, 4294967232  ;;  %s1803_s0 = sand.u32 1, %s1696_s11   ;;  %s1068_s18 = sshll.u32 %s1792_s27, 7 }
  0x42   : > { %s435_s16 = scalar_lea.sflag [#allocation7], %s1803_s0  ;;  %s1807_s26 = scalar_lea.vmem [#allocation6], %s1068_s18 }
  0x43   : > { %1572 = dma.done.wait (%p1707_p4), %s435_s16, 2080  }
  0x44   : > { %1574 = vsyncadd (%p1707_p4), %s435_s16, 4294965216  ;;  %s1069_s8 = sshll.u32 %s1792_s27, 1  ;;  %s1815_s29 = sshll.u32 %s1792_s27, 3 }
  0x45   : > { %s1817_s19 = scalar_lea.vmem [#allocation8], %s1069_s8  ;;  %s455_s24 = scalar_lea.sflag [#allocation10], %s1803_s0 }
  0x46   : > { %s458_s12 = scalar_lea.vmem [#allocation9], %s1815_s29 }
  0x47   : > { %1576 = dma.done.wait (%p1707_p4), %s455_s24, 128  }
  0x48   : > { %1578 = vsyncadd (%p1707_p4), %s455_s24, 4294967168 }
  0x49   : > { %1580 = dma.done.wait (%p76_p1), [#allocation10], 1024  }
  0x4a   : > { %1582 = vsyncadd (%p76_p1), [#allocation10], 4294966272  ;;  %v1194_v0 = vld [vmem:[%s1807_s26 + $0x74] sm:$0xf]  ;;  %v1135_v1 = vld [vmem:[%s1807_s26 + $0x78] sm:$0xf0] }
  0x4b   : > { %v1192_v2 = vld [vmem:[%s1807_s26 + $0x64] sm:$0xf]  ;;  %v1138_v3 = vor.u32 %v1194_v0, %v1135_v1  ;;  %v1127_v4 = vld [vmem:[%s1807_s26 + $0x68] sm:$0xf0]  ;;  %v1133_v5 = vld [vmem:[%s1807_s26 + $0x70] sm:$0xf] }
  0x4c   : > { %v1195_v6 = vld [vmem:[%s1807_s26 + $0x74] sm:$0xf0]  ;;  %v1125_v8 = vld [vmem:[%s1807_s26 + $0x60] sm:$0xf]  ;;  %v1130_v9 = vor.u32 %v1192_v2, %v1127_v4  ;;  %v1193_v10 = vld [vmem:[%s1807_s26 + $0x64] sm:$0xf0] }
  0x4d   : > { %v1134_v7 = vor.u32 %v1195_v6, %v1133_v5  ;;  %648 = vmatpush.bf16.msra.mxu1 %v1138_v3  ;;  %v1190_v11 = vld [vmem:[%s1807_s26 + $0x54] sm:$0xf]  ;;  %v1119_v12 = vld [vmem:[%s1807_s26 + $0x58] sm:$0xf0]  ;;  %v1126_v13 = vor.u32 %v1193_v10, %v1125_v8  ;;  %v1117_v14 = vld [vmem:[%s1807_s26 + $0x50] sm:$0xf] }
  0x4e   : > { %v1191_v15 = vld [vmem:[%s1807_s26 + $0x54] sm:$0xf0]  ;;  %v1122_v16 = vor.u32 %v1190_v11, %v1119_v12  ;;  %v1188_v17 = vld [vmem:[%s1807_s26 + $0x44] sm:$0xf]  ;;  %v1111_v18 = vld [vmem:[%s1807_s26 + $0x48] sm:$0xf0] }
  0x4f   : > { %635 = vmatpush.bf16.msra.mxu0 %v1134_v7  ;;  %v1118_v19 = vor.u32 %v1191_v15, %v1117_v14  ;;  %v1109_v20 = vld [vmem:[%s1807_s26 + $0x40] sm:$0xf]  ;;  %v1189_v21 = vld [vmem:[%s1807_s26 + $0x44] sm:$0xf0]  ;;  %v1114_v22 = vor.u32 %v1188_v17, %v1111_v18  ;;  %v1203_v23 = vld [vmem:[#allocation11 + $0x38] sm:$0xff]  ;;  %s510_s11 = scalar_lea.vmem [#allocation12], %s1815_s29 }
  0x50   : > { %v1186_v24 = vld [vmem:[%s1807_s26 + $0x34] sm:$0xf]  ;;  %v1103_v25 = vld [vmem:[%s1807_s26 + $0x38] sm:$0xf0]  ;;  %v1110_v26 = vor.u32 %v1189_v21, %v1109_v20  ;;  %v1101_v27 = vld [vmem:[%s1807_s26 + $0x30] sm:$0xf]  ;;  %740 = vmatpush.bf16.msra.mxu2 %v1203_v23 }
  0x51   : > { %649 = vmatpush.bf16.msra.mxu1 %v1130_v9  ;;  %v1187_v28 = vld [vmem:[%s1807_s26 + $0x34] sm:$0xf0]  ;;  %v1202_v29 = vld [vmem:[#allocation11 + $0x30] sm:$0xff]  ;;  %v1106_v30 = vor.u32 %v1186_v24, %v1103_v25  ;;  %v1095_v32 = vld [vmem:[%s1807_s26 + $0x28] sm:$0xf0]  ;;  %s517_s13 = scalar_lea.vmem [#allocation13], %s1815_s29 }
  0x52   : > { %v1184_v31 = vld [vmem:[%s1807_s26 + $0x24] sm:$0xf]  ;;  %v1102_v33 = vor.u32 %v1187_v28, %v1101_v27  ;;  %v1093_v34 = vld [vmem:[%s1807_s26 + $0x20] sm:$0xf]  ;;  %v1185_v35 = vld [vmem:[%s1807_s26 + $0x24] sm:$0xf0] }
  0x53   : > { %636 = vmatpush.bf16.msra.mxu0 %v1126_v13  ;;  %v1201_v36 = vld [vmem:[#allocation11 + $0x28] sm:$0xff]  ;;  %v1098_v37 = vor.u32 %v1184_v31, %v1095_v32  ;;  %v1182_v38 = vld [vmem:[%s1807_s26 + $0x14] sm:$0xf]  ;;  %v1094_v40 = vor.u32 %v1185_v35, %v1093_v34  ;;  %v1085_v41 = vld [vmem:[%s1807_s26 + $0x10] sm:$0xf]  ;;  %s1870_s4 = sshll.u32 %s1605_s30, 3 }
  0x54   : > { %741 = vmatpush.bf16.msra.mxu2 %v1202_v29  ;;  %v1087_v39 = vld [vmem:[%s1807_s26 + $0x18] sm:$0xf0]  ;;  %v1183_v42 = vld [vmem:[%s1807_s26 + $0x14] sm:$0xf0]  ;;  %v1180_v44 = vld [vmem:[%s1807_s26 + $0x4] sm:$0xf]  ;;  %s791_s21 = scalar_lea.hbm %s1958_s7, %s1870_s4  ;;  %s776_s22 = scalar_lea.hbm %s1957_s6, %s1870_s4 }
  0x55   : > { %650 = vmatpush.bf16.msra.mxu1 %v1122_v16  ;;  %v1090_v43 = vor.u32 %v1182_v38, %v1087_v39  ;;  %v1079_v45 = vld [vmem:[%s1807_s26 + $0x8] sm:$0xf0]  ;;  %v1086_v46 = vor.u32 %v1183_v42, %v1085_v41  ;;  %v1077_v47 = vld [vmem:[%s1807_s26] sm:$0xf]  ;;  %v1181_v48 = vld [vmem:[%s1807_s26 + $0x4] sm:$0xf0] }
  0x56   : > { %v1082_v49 = vor.u32 %v1180_v44, %v1079_v45  ;;  %v1078_v50 = vor.u32 %v1181_v48, %v1077_v47  ;;  %v532_v51 = vld [vmem:[%s1796_s14] sm:$0xf]  ;;  %v1199_v53 = vld [vmem:[#allocation11 + $0x18] sm:$0xff]  ;;  %v1198_v54 = vld [vmem:[#allocation11 + $0x10] sm:$0xff]  ;;  %s793_s20 = sshll.u32 %s517_s13, 4  ;;  %s795_s1 = sshll.u32 %s791_s21, 4  ;;  %s794_s20 = int_to_ptr.vmem [resolvable:$true] %s793_s20  ;;  %s796_s1 = int_to_ptr.hbm [resolvable:$true] %s795_s1 }
  0x57   : > { %637 = vmatpush.bf16.msra.mxu0 %v1118_v19  ;;  %v1200_v52 = vld [vmem:[#allocation11 + $0x20] sm:$0xff]  ;;  %v1197_v55 = vld [vmem:[#allocation11 + $0x8] sm:$0xff]  ;;  %v666_v4 = vld [vmem:[%s458_s12] sm:$0xff]  ;;  %s760_s14 = scalar_lea.sflag [#allocation14], %s1803_s0  ;;  %s1473_s18 = sshra.s32 %s796_s1, 4  ;;  %s1474_s18 = int_to_ptr.hbm [resolvable:$true] %s1473_s18 }
  0x58   : > { %742 = vmatpush.bf16.msra.mxu2 %v1201_v36  ;;  %v1196_v56 = vld [vmem:[#allocation11] sm:$0xff]  ;;  %v549_v57 = vld [vmem:[%s1817_s19] sm:$0x3]  ;;  %s1475_s16 = scalar_lea.hbm %s1474_s18, 8  ;;  %s1479_s8 = scalar_lea.hbm %s1958_s7, 16 }
  0x59   : > { %651 = vmatpush.bf16.msra.mxu1 %v1114_v22  ;;  %v552_v58 = vperm.slane %v549_v57, 1  ;;  %v551_v59 = vperm.slane %v549_v57, 0  ;;  %p1476_p1 = scmp.ne.s32.totalorder %s1474_s18, %s1475_s16  ;;  %p1480_p8 = scmp.lt.s32.totalorder %s1474_s18, %s1958_s7 }
  0x5a   : > { %p1481_p12 = scmp.lt.s32.totalorder %s1479_s8, %s1475_s16 }
  0x5b   : > { %638 = vmatpush.bf16.msra.mxu0 %v1110_v26  ;;  %p1477_p2 = pnand %p1476_p1, %p1738_p5 }
  0x5c   : > { %743 = vmatpush.bf16.msra.mxu2 %v1200_v52  ;;  %p1482_p13 = por %p1481_p12, %p1480_p8 }
  0x5d   : > { %652 = vmatpush.bf16.msra.mxu1 %v1106_v30  ;;  %p1478_p4 = pneg %p1477_p2 }
  0x5f   : > { %639 = vmatpush.bf16.msra.mxu0 %v1102_v33  ;;  %p1483_p0 = pnand %p1482_p13, %p1478_p4 }
  0x60   : > { %744 = vmatpush.bf16.msra.mxu2 %v1199_v53 }
  0x61   : > { %653 = vmatpush.bf16.msra.mxu1 %v1098_v37 }
  0x63   : > { %640 = vmatpush.bf16.msra.mxu0 %v1094_v40 }
  0x64   : > { %745 = vmatpush.bf16.msra.mxu2 %v1198_v54 }
  0x65   : > { %654 = vmatpush.bf16.msra.mxu1 %v1090_v43 }
  0x67   : > { %641 = vmatpush.bf16.msra.mxu0 %v1086_v46 }
  0x68   : > { %746 = vmatpush.bf16.msra.mxu2 %v1197_v55 }
  0x69   : > { %655 = vmatpush.bf16.msra.mxu1 %v1082_v49 }
  0x6b   : > { %642 = vmatpush.bf16.msra.mxu0 %v1078_v50 }
  0x6c   : > { %656 = vmatmul.bf16.vlgmr.msra.gmra.mxu1 %v532_v51  ;;  %747 = vmatpush.bf16.msra.mxu2 %v1196_v56 }
  0x6e   : > { %643 = vmatmul.bf16.vlgmr.msra.gmra.mxu0 %v532_v51 }
  0xe9   : > { %v657_v60 = vpop.f32.mrf.mxu1 }
  0xea   : > { %v658_v61 = vadd.f32 %v657_v60, %v552_v58 }
  0xeb   : > { %v644_v62 = vpop.f32.mrf.mxu0 }
  0xec   : > { %v645_v63 = vadd.f32 %v644_v62, %v551_v59  ;;  %v661_v0 = vmul.f32 0.5, %v658_v61 }
  0xee   : > { %664 = vst [vmem:[%s510_s11] sm:$0xff] %v645_v63  ;;  %v662_v1 = vmul.f32 1.442695, %v661_v0 }
  0xf0   : > { %1307 = vpow2.f32 %v662_v1 }
  0xf1   : > { %v659_v2 = vpop.f32.mrf.mxu1 }
  0xf3   : > { %v646_v3 = vpop.f32.mrf.mxu0 }
  0xf6   : > { %v1308_v5 = vpop.eup %1307 }
  0xf7   : > { %v667_v6 = vmul.f32 %v1308_v5, %v666_v4  ;;  %665 = vst [vmem:[%s517_s13] sm:$0xff] %v1308_v5 }
  0xf9   : > { %v668_v7 = vadd.f32 %v667_v6, %v645_v63 }
  0xfb   : > { %v671_v8 = vpack.c.bf16 %v668_v7, %v668_v7 }
  0xfd   : > { %748 = vmatmul.bf16.vlgmr.msra.gmra.mxu2 %v671_v8 }
  0xfe   : > { %1486 = shalt.err (!%p1483_p0)
}
  0xff   : > { %1217 = dma.vmem_to_hbm [thread:$0]  (%p1738_p5), %s794_s20, 128, %s796_s1, %s760_s14  }
 0x100   : > { %s778_s12 = sshll.u32 %s510_s11, 4  ;;  %s780_s13 = sshll.u32 %s776_s22, 4  ;;  %s779_s12 = int_to_ptr.vmem [resolvable:$true] %s778_s12  ;;  %s781_s13 = int_to_ptr.hbm [resolvable:$true] %s780_s13 }
 0x101   : > { %s755_s17 = scalar_lea.sflag [#allocation5], %s1792_s27  ;;  %s1501_s23 = sshra.s32 %s781_s13, 4  ;;  %s1502_s23 = int_to_ptr.hbm [resolvable:$true] %s1501_s23 }
 0x102   : > { %s1503_s21 = scalar_lea.hbm %s1502_s23, 8  ;;  %s1507_s18 = scalar_lea.hbm %s1957_s6, 16 }
 0x103   : > { %p1504_p3 = scmp.ne.s32.totalorder %s1502_s23, %s1503_s21  ;;  %p1508_p10 = scmp.lt.s32.totalorder %s1502_s23, %s1957_s6 }
 0x104   : > { %p1509_p1 = scmp.lt.s32.totalorder %s1507_s18, %s1503_s21 }
 0x105   : > { %p1505_p7 = pnand %p1504_p3, %p1738_p5 }
 0x106   : > { %p1510_p2 = por %p1509_p1, %p1508_p10 }
 0x107   : > { %p1506_p9 = pneg %p1505_p7 }
 0x109   : > { %p1511_p4 = pnand %p1510_p2, %p1506_p9 }
 0x10b   : > { %1514 = shalt.err (!%p1511_p4)
}
 0x10c   : > { %1216 = dma.vmem_to_hbm [thread:$0]  (%p1738_p5), %s779_s12, 128, %s781_s13, %s755_s17  }
 0x10d   : > { %s1986_s20 = sld [smem:[#allocation31_spill]]  ;;  %s524_s19 = scalar_lea.vmem [#allocation15], %s1815_s29 }
 0x10e   : > { %s1987_s8 = sld [smem:[#allocation30_spill]]  ;;  %s809_s24 = sshll.u32 %s524_s19, 4  ;;  %s810_s24 = int_to_ptr.vmem [resolvable:$true] %s809_s24 }
 0x113   : > { %s807_s1 = scalar_lea.hbm %s1986_s20, %s1870_s4  ;;  %s1535_s13 = scalar_lea.hbm %s1986_s20, 16 }
 0x114   : > { %v1306_v9 = vld [vmem:[%s1987_s8] ss:$0 sm:$0xff]  ;;  %s811_s23 = sshll.u32 %s807_s1, 4  ;;  %s812_s23 = int_to_ptr.hbm [resolvable:$true] %s811_s23 }
 0x115   : > { %s1529_s21 = sshra.s32 %s812_s23, 4  ;;  %s1530_s21 = int_to_ptr.hbm [resolvable:$true] %s1529_s21 }
 0x116   : > { %s1531_s5 = scalar_lea.hbm %s1530_s21, 8  ;;  %p1536_p0 = scmp.lt.s32.totalorder %s1530_s21, %s1986_s20 }
 0x117   : > { %p1532_p8 = scmp.ne.s32.totalorder %s1530_s21, %s1531_s5  ;;  %p1537_p3 = scmp.lt.s32.totalorder %s1535_s13, %s1531_s5 }
 0x119   : > { %p1533_p12 = pnand %p1532_p8, %p1738_p5  ;;  %p1538_p7 = por %p1537_p3, %p1536_p0 }
 0x11b   : > { %p1534_p13 = pneg %p1533_p12 }
 0x11d   : > { %p1539_p9 = pnand %p1538_p7, %p1534_p13 }
 0x180   : > { %v749_v10 = vpop.f32.mrf.mxu2 }
 0x181   : > { %v750_v11 = vadd.f32 %v1306_v9, %v749_v10 }
 0x183   : > { %753 = vst [vmem:[%s524_s19] sm:$0xff] %v750_v11 }
 0x184   : > { %1542 = shalt.err (!%p1539_p9)
}
 0x185   : > { %1218 = dma.vmem_to_hbm [thread:$0]  (%p1738_p5), %s810_s24, 128, %s812_s23, %s760_s14  }
 0x188   : > { %v751_v12 = vpop.f32.mrf.mxu2 }
 0x189 PF: > { %s1988_s15 = sld [smem:[#allocation22_spill]]  ;;  %p1240_p10 = pnand %p1056_p11, %p1712_p6 }
 0x18b   : > { %p1241_p1 = pneg %p1240_p10 }
 0x18f   : > { %s823_s16 = sand.u32 1, %s1988_s15  }
 0x190   : > { %s824_s30 = scalar_lea.sflag [#allocation5], %s823_s16 }
 0x191   : > { %1584 = dma.done.wait (%p1241_p1), %s824_s30, 128  }
 0x192   : > { %1586 = vsyncadd (%p1241_p1), %s824_s30, 4294967168  ;;  %s1990_s27 = sadd.s32 4294967294, %s1613_s10  }
 0x193   : > { %s833_s11 = sand.u32 1, %s1990_s27  }
 0x194   : > { %s834_s25 = scalar_lea.sflag [#allocation14], %s833_s11 }
 0x195   : > { %1588 = dma.done.wait (%p1241_p1), %s834_s25, 256  }
 0x196   : > { %1590 = vsyncadd (%p1241_p1), %s834_s25, 4294967040  ;;  %s34_s10 = sadd.s32 1, %s1613_s10   ;;  %s1991_s0 = sld [smem:[#allocation23_spill]] }
 0x197   : > { %p31_p5 = scmp.ge.s32.totalorder %s34_s10, 4   ;;  %s1992_s29 = sld [smem:[#allocation26_spill]] }
 0x198   : > { %s1993_s14 = sld [smem:[#allocation25_spill]]  ;;  %s1994_s27 = smov %s1597_s28 }
 0x199   : > { %s1996_s30 = smov %s1609_s9 }
 0x19a   :  { %33 = sbr.rel (!%p31_p5) target bundleno = 18 (0x12), region = 170 }
 0x19c   : > { %s1995_s28 = smov %s1991_s0 }
 0x19e   : > { %s1997_s9 = smov %s1993_s14 }
 0x19f   :  { %850 = vsyncpa [#allocation4], 1 }
 0x1a0   :  { %852 = vsyncpa [#allocation4 + $0x1], 1 }
 0x1a1   :  { %853 = vsyncpa [#allocation7], 1 }
 0x1a2   :  { %855 = vsyncpa [#allocation7 + $0x1], 1 }
 0x1a3   :  { %856 = vsyncpa [#allocation10], 1 }
 0x1a4   :  { %858 = vsyncpa [#allocation10 + $0x1], 1 }
 0x1a5   :  { %859 = vsyncpa [#allocation5], 1 }
 0x1a6   :  { %861 = vsyncpa [#allocation5 + $0x1], 1 }
 0x1a7   :  { %862 = vsyncpa [#allocation14], 1 }
 0x1a8   :  { %864 = vsyncpa [#allocation14 + $0x1], 1 }

</bundles_post_ra>
